<compile_context>
chip_gen: v6e
topology: v6e:2x2x1
jax: 0.10.0
libtpu: 0.0.40
codegen_flags: <defaults>
</compile_context>

<pallas_src>
import math

import jax
import jax.numpy as jnp
from jax.experimental import pallas as pl
from jax.experimental.pallas import tpu as pltpu


def _round_up(x, m):
    return ((x + m - 1) // m) * m


def _cdiv(a, b):
    return -(-a // b)


def _sincos_pe_kernel(idx_ref, const_ref, out_ref):
    """Sin/cos positional encodings, lane-packed.

    idx_ref:   (TN, K) int32    -- K consecutive position indices per packed row
    const_ref: (K+1, K*D) f32   -- rows 0..K-1: selector(slot)*inv_freq(feature)
                                   row K: phase (0 for sin lanes, pi/2 for cos lanes)
    out_ref:   (TN, K*D) f32    -- out[i, p*D + f] = encoding(idx[i, p], f)
    """
    k = idx_ref.shape[-1]
    pos = idx_ref[...].astype(jnp.float32)                     # (TN, K)
    # Accumulate pos[slot] * inv_freq[feature] for the slot owning each lane,
    # starting from the per-lane phase.  k is a static Python int -> unrolled.
    x = pos[:, 0:1] * const_ref[0:1, :] + const_ref[k:k + 1, :]
    for p in range(1, k):
        x = x + pos[:, p:p + 1] * const_ref[p:p + 1, :]
    # sin(x) on even features, sin(x + pi/2) == cos(x) on odd features.
    out_ref[...] = jnp.sin(x)


class SinCosPositionalEncoding:
    """JAX/Pallas equivalent of the PyTorch SinCosPositionalEncoding module."""

    def __init__(self, d_model, max_position=100, max_rows_per_step=1 << 17):
        assert d_model % 2 == 0, "d_model must be even (matches torch table layout)"
        self.d_model = d_model
        self.max_position = max_position          # kept for API fidelity (table extent)
        self._max_rows_per_step = max(1, int(max_rows_per_step))

        self._k = self._pick_pack(d_model)        # positions packed per output row
        self._kd = self._k * d_model
        self._kd_pad = _round_up(self._kd, 128)
        self._const = self._build_const(d_model, self._k)

        # Per-generation VMEM budget: v5e/v6e have 128 MiB physical VMEM -> large
        # blocks amortize the ~0.35 us/step overhead; v7x has 64 MiB/TC -> cap.
        big_vmem = self._vmem_capacity() >= 100 * 1024 * 1024
        self._block_budget_bytes = (48 if big_vmem else 20) * 1024 * 1024
        self._vmem_limit_bytes = (64 if big_vmem else 40) * 1024 * 1024

        self._compiled = {}                        # cache: n -> jitted runner

    # ---------- static configuration helpers ----------

    @staticmethod
    def _vmem_capacity():
        try:
            return int(pltpu.get_tpu_info().vmem_capacity_bytes)
        except Exception:
            return 64 * 1024 * 1024                # conservative (v7x per-TC)

    @staticmethod
    def _pick_pack(d):
        """Positions per 128-lane output row so stores are lane-dense."""
        if d >= 128:
            return 1
        if 128 % d == 0:
            return 128 // d
        k = 128 // math.gcd(d, 128)                # smallest k with (k*d) % 128 == 0
        return k if k * d <= 1024 else max(1, 128 // d)

    @staticmethod
    def _build_const(d, k):
        """(k+1, k*d) f32: rows 0..k-1 = slot-selector * inv_freq, row k = phase."""
        lane = jnp.arange(k * d, dtype=jnp.int32)
        feat = lane % d                            # feature index within a position
        slot = lane // d                           # which packed position owns this lane
        parity = feat % 2                          # 0 = sin lane, 1 = cos lane
        two_i = (feat - parity).astype(jnp.float32)
        inv_freq = jnp.exp(two_i * (-math.log(10000.0) / d))   # matches torch div_term
        phase = jnp.where(parity == 0, 0.0, 0.5 * math.pi).astype(jnp.float32)
        sel = (slot[None, :] == jnp.arange(k, dtype=jnp.int32)[:, None]).astype(jnp.float32)
        w = sel * inv_freq[None, :]
        return jnp.concatenate([w, phase[None, :]], axis=0)

    def _pick_tn(self, n_pack):
        # Double-buffered VMEM per step: out block (tn, kd_pad) + lane-padded idx
        # block (tn, 128), both f32/int32.
        bytes_per_row = 4 * (self._kd_pad + 128)
        tn = self._block_budget_bytes // (2 * bytes_per_row)
        tn = min(tn, self._max_rows_per_step)
        if n_pack > 16:
            # >= 2 grid steps so both TensorCores get work on v7x megacore.
            tn = min(tn, _round_up(_cdiv(n_pack, 2), 8))
        tn = max(8, (tn // 8) * 8)
        return n_pack if tn >= n_pack else tn      # single full block for tiny inputs

    # ---------- build / call ----------

    def _build(self, n):
        d, k, kd = self.d_model, self._k, self._kd
        n_pack = _cdiv(n, k)
        pad = n_pack * k - n
        tn = self._pick_tn(n_pack)
        grid = (_cdiv(n_pack, tn),)                # partial edge block handled by Pallas

        call = pl.pallas_call(
            _sincos_pe_kernel,
            out_shape=jax.ShapeDtypeStruct((n_pack, kd), jnp.float32),
            grid=grid,
            in_specs=[
                pl.BlockSpec((tn, k), lambda i: (i, 0)),          # packed indices
                pl.BlockSpec((k + 1, kd), lambda i: (0, 0)),      # VMEM-resident constants
            ],
            out_specs=pl.BlockSpec((tn, kd), lambda i: (i, 0)),
            compiler_params=pltpu.CompilerParams(
                dimension_semantics=("parallel",),                # rows independent
                vmem_limit_bytes=self._vmem_limit_bytes,
            ),
            cost_estimate=pl.CostEstimate(
                flops=2 * (k + 1) * n_pack * kd,
                transcendentals=n_pack * kd,
                bytes_accessed=4 * (n_pack * kd + n_pack * k) + 4 * int(self._const.size),
            ),
        )

        @jax.jit
        def run(indices, const):
            idx = indices.astype(jnp.int32)
            if pad:                                 # static: pad only the tiny index array
                idx = jnp.pad(idx, (0, pad))
            out = call(idx.reshape(n_pack, k), const)             # (n_pack, k*d)
            out = out.reshape(n_pack * k, d)        # free: identical row-major bytes
            if pad:
                out = out[:n]                       # only for ragged n % k (<= k-1 rows)
            return out

        return run

    def __call__(self, indices):
        indices = jnp.asarray(indices, dtype=jnp.int32)
        n = int(indices.shape[0])
        fn = self._compiled.get(n)
        if fn is None:
            fn = self._build(n)
            self._compiled[n] = fn
        return fn(indices, self._const)


def _reference(indices, d_model, max_position):
    """Pure-JAX reference mirroring the PyTorch buffer construction + gather."""
    position = jnp.arange(0, max_position, dtype=jnp.float32)[:, None]
    div_term = jnp.exp(
        jnp.arange(0, d_model, 2, dtype=jnp.float32) * (-math.log(10000.0) / d_model)
    )
    pe = jnp.zeros((max_position, d_model), dtype=jnp.float32)
    pe = pe.at[:, 0::2].set(jnp.sin(position * div_term))
    pe = pe.at[:, 1::2].set(jnp.cos(position * div_term))
    return pe[indices, :]


if __name__ == "__main__":
    key = jax.random.PRNGKey(0)
    k1, k2, k3 = jax.random.split(key, 3)
    max_position = 100

    # Case 1: toy size near the PyTorch defaults (d=32 -> 4 positions per lane row,
    # single-block grid, no tail).
    d1, n1 = 32, 8
    idx1 = jax.random.randint(k1, (n1,), 0, max_position, dtype=jnp.int32)
    mod1 = SinCosPositionalEncoding(d1, max_position=max_position)
    out1 = jax.block_until_ready(mod1(idx1))
    ref1 = _reference(idx1, d1, max_position)
    assert out1.shape == (n1, d1) and out1.dtype == jnp.float32
    assert jnp.allclose(out1, ref1, atol=2e-5, rtol=1e-5), "mismatch vs reference (case 1)"

    # Case 2: ragged n (n % k != 0), multi-step parallel grid with a partial edge block.
    d2, n2 = 32, 203
    idx2 = jax.random.randint(k2, (n2,), 0, max_position, dtype=jnp.int32)
    mod2 = SinCosPositionalEncoding(d2, max_position=max_position, max_rows_per_step=16)
    out2 = jax.block_until_ready(mod2(idx2))
    ref2 = _reference(idx2, d2, max_position)
    assert out2.shape == (n2, d2)
    assert jnp.allclose(out2, ref2, atol=2e-5, rtol=1e-5), "mismatch vs reference (case 2)"

    # Case 3: d_model >= 128 path (already lane-dense, k=1).
    d3, n3 = 256, 24
    idx3 = jax.random.randint(k3, (n3,), 0, max_position, dtype=jnp.int32)
    mod3 = SinCosPositionalEncoding(d3, max_position=max_position)
    out3 = jax.block_until_ready(mod3(idx3))
    ref3 = _reference(idx3, d3, max_position)
    assert out3.shape == (n3, d3)
    assert jnp.allclose(out3, ref3, atol=2e-5, rtol=1e-5), "mismatch vs reference (case 3)"

    print("KERNEL_OK")
</pallas_src>

<mosaic_0001>
module attributes {stable_mosaic.version = 11 : i64} {
  func.func @_sincos_pe_kernel(%arg0: i32, %arg1: memref<2x4xi32, #tpu.memory_space<vmem>>, %arg2: memref<5x128xf32, #tpu.memory_space<vmem>>, %arg3: memref<2x128xf32, #tpu.memory_space<vmem>>) attributes {dimension_semantics = [#tpu.dimension_semantics<parallel>], iteration_bounds = array<i64: 1>, scalar_prefetch = 0 : i64, scratch_operands = 0 : i64, tpu.core_type = #tpu.core_type<tc>, window_params = [{transform_indices = @transform_0, window_bounds = array<i64: 2, 4>}, {pipeline_mode = #tpu.pipeline_mode<synchronous>, transform_indices = @transform_1, window_bounds = array<i64: 5, 128>}, {transform_indices = @transform_2, window_bounds = array<i64: 2, 128>}]} {
    %c0 = arith.constant 0 : index
    %c0_0 = arith.constant 0 : index
    %0 = vector.load %arg1[%c0, %c0_0] : memref<2x4xi32, #tpu.memory_space<vmem>>, vector<2x4xi32>
    %1 = arith.sitofp %0 : vector<2x4xi32> to vector<2x4xf32>
    %2 = vector.extract_strided_slice %1 {offsets = [0, 0], sizes = [2, 1], strides = [1, 1]} : vector<2x4xf32> to vector<2x1xf32>
    %c0_1 = arith.constant 0 : index
    %c0_2 = arith.constant 0 : index
    %3 = vector.load %arg2[%c0_1, %c0_2] : memref<5x128xf32, #tpu.memory_space<vmem>>, vector<1x128xf32>
    %4 = vector.broadcast %2 : vector<2x1xf32> to vector<2x128xf32>
    %5 = vector.broadcast %3 : vector<1x128xf32> to vector<2x128xf32>
    %6 = arith.mulf %4, %5 : vector<2x128xf32>
    %c4 = arith.constant 4 : index
    %c0_3 = arith.constant 0 : index
    %7 = vector.load %arg2[%c4, %c0_3] : memref<5x128xf32, #tpu.memory_space<vmem>>, vector<1x128xf32>
    %8 = vector.broadcast %7 : vector<1x128xf32> to vector<2x128xf32>
    %9 = arith.addf %6, %8 : vector<2x128xf32>
    %10 = vector.extract_strided_slice %1 {offsets = [0, 1], sizes = [2, 1], strides = [1, 1]} : vector<2x4xf32> to vector<2x1xf32>
    %c1 = arith.constant 1 : index
    %c0_4 = arith.constant 0 : index
    %11 = vector.load %arg2[%c1, %c0_4] : memref<5x128xf32, #tpu.memory_space<vmem>>, vector<1x128xf32>
    %12 = vector.broadcast %10 : vector<2x1xf32> to vector<2x128xf32>
    %13 = vector.broadcast %11 : vector<1x128xf32> to vector<2x128xf32>
    %14 = arith.mulf %12, %13 : vector<2x128xf32>
    %15 = arith.addf %9, %14 : vector<2x128xf32>
    %16 = vector.extract_strided_slice %1 {offsets = [0, 2], sizes = [2, 1], strides = [1, 1]} : vector<2x4xf32> to vector<2x1xf32>
    %c2 = arith.constant 2 : index
    %c0_5 = arith.constant 0 : index
    %17 = vector.load %arg2[%c2, %c0_5] : memref<5x128xf32, #tpu.memory_space<vmem>>, vector<1x128xf32>
    %18 = vector.broadcast %16 : vector<2x1xf32> to vector<2x128xf32>
    %19 = vector.broadcast %17 : vector<1x128xf32> to vector<2x128xf32>
    %20 = arith.mulf %18, %19 : vector<2x128xf32>
    %21 = arith.addf %15, %20 : vector<2x128xf32>
    %22 = vector.extract_strided_slice %1 {offsets = [0, 3], sizes = [2, 1], strides = [1, 1]} : vector<2x4xf32> to vector<2x1xf32>
    %c3 = arith.constant 3 : index
    %c0_6 = arith.constant 0 : index
    %23 = vector.load %arg2[%c3, %c0_6] : memref<5x128xf32, #tpu.memory_space<vmem>>, vector<1x128xf32>
    %24 = vector.broadcast %22 : vector<2x1xf32> to vector<2x128xf32>
    %25 = vector.broadcast %23 : vector<1x128xf32> to vector<2x128xf32>
    %26 = arith.mulf %24, %25 : vector<2x128xf32>
    %27 = arith.addf %21, %26 : vector<2x128xf32>
    %28 = math.sin %27 : vector<2x128xf32>
    %c0_7 = arith.constant 0 : index
    %c0_8 = arith.constant 0 : index
    %29 = vector.load %arg3[%c0_7, %c0_8] : memref<2x128xf32, #tpu.memory_space<vmem>>, vector<2x128xf32>
    tpu.vector_store %arg3[%c0_7, %c0_8], %28 {strides = array<i32>} : memref<2x128xf32, #tpu.memory_space<vmem>>, vector<2x128xf32>,
    return
  }
  func.func @transform_0(%arg0: i32) -> (i32, i32) {
    %c0_i32 = arith.constant 0 : i32
    %c0_i32_0 = arith.constant 0 : i32
    return %arg0, %c0_i32 : i32, i32
  }
  func.func @transform_1(%arg0: i32) -> (i32, i32) {
    %c0_i32 = arith.constant 0 : i32
    %c0_i32_0 = arith.constant 0 : i32
    %c0_i32_1 = arith.constant 0 : i32
    return %c0_i32, %c0_i32_0 : i32, i32
  }
  func.func @transform_2(%arg0: i32) -> (i32, i32) {
    %c0_i32 = arith.constant 0 : i32
    %c0_i32_0 = arith.constant 0 : i32
    return %arg0, %c0_i32 : i32, i32
  }
}

</mosaic_0001>

<bundles_post_ra>
// kernel: run.1
= control target key start
LH: loop header
LB: loop body
LE: loop exit
PB: predicated region body
PF: predicated region fallthrough
CT: control target
= control target key end

     0   :  { %7 = vsyncpa [#allocation3], 0  ;;  %s240_s9 = smov [#allocation2]   ;;  %s296_s0 = inlined_call_operand.vmem [shape: s32[2,4], index: 0, kind: input, shape index: {}]   ;;  %s297_s1 = inlined_call_operand.hbm [shape: f32[5,128], index: 1, kind: input, shape index: {}]   ;;  %s298_s2 = inlined_call_operand.vmem [shape: f32[2,128], index: 2, kind: output, shape index: {}]  }
   0x1   :  { %s16_s10 = sshll.u32 %s240_s9, 4  ;;  %s17_s10 = int_to_ptr.vmem [resolvable:$true] %s16_s10 }
   0x2   :  { %s226_s11 = scalar_lea.vmem %s17_s10, 128  ;;  %p231_p1 = scmp.lt.s32.totalorder %s17_s10, %s17_s10 }
   0x3   :  { %p227_p0 = scmp.ne.s32.totalorder %s17_s10, %s226_s11  ;;  %p232_p2 = scmp.lt.s32.totalorder %s226_s11, %s226_s11 }
   0x5   :  { %p233_p3 = por %p232_p2, %p231_p1 }
   0x7   :  { %p234_p4 = pnand %p233_p3, %p227_p0 }
   0x9   :  { %237 = shalt.err (!%p234_p4)
}
   0xa   :  { %19 = dma.hbm_to_vmem [thread:$0]  %s297_s1, 128, %s17_s10, [#allocation3]  }
   0xb   :  { %238 = dma.done.wait [#allocation3], 128  }
   0xc   :  { %239 = vsyncadd [#allocation3], 4294967168  ;;  %v241_v0 = vmov 0   ;;  %v242_v1 = vmov 2   ;;  %v23_v2 = vld [vmem:[%s296_s0] sm:$0x3] }
   0xd   :  { %209 = vset.pattern.permute.xlu0 %v241_v0  ;;  %211 = vset.pattern.permute.xlu1 %v242_v1  ;;  %v24_v3 = vcvt.s32.f32 %v23_v2  ;;  %v243_v4 = vmov 1   ;;  %v244_v5 = vmov 3   ;;  %v185_v6 = vld [vmem:[#allocation2] ss:$0 sm:$0xff]  ;;  %v186_v10 = vld [vmem:[#allocation2 + $0x4] ss:$0 sm:$0xff] }
   0xe   :  { %v187_v11 = vld [vmem:[#allocation2 + $0x1] ss:$0 sm:$0xff]  ;;  %v188_v12 = vld [vmem:[#allocation2 + $0x2] ss:$0 sm:$0xff]  ;;  %v189_v14 = vld [vmem:[#allocation2 + $0x3] ss:$0 sm:$0xff] }
   0xf   :  { %28 = vperm.xlu0 %209, %v24_v3   ;;  %55 = vperm.xlu1 %211, %v24_v3   ;;  %v245_v33 = vmov 683565275   ;;  %v246_v35 = vmov 2475754826   ;;  %v247_v38 = vmov 2131351028  }
  0x10   :  { %v248_v41 = vmov 2102212464   ;;  %v249_v44 = vmov 920167782   ;;  %v250_v47 = vmov 1326507024  }
  0x13   :  { %210 = vset.pattern.permute.xlu0 %v243_v4  ;;  %212 = vset.pattern.permute.xlu1 %v244_v5 }
  0x14   :  { %44 = vperm.xlu0 %210, %v24_v3   ;;  %66 = vperm.xlu1 %212, %v24_v3  }
  0x18   :  { %213 = vset.pattern.permute.xlu0 %v244_v5 }
  0x8a   :  { %v29_v7 = vpop.permute.xlu0 %28  ;;  %v56_v8 = vpop.permute.xlu1 %55 }
  0x8b   :  { %v35_v9 = vmul.f32 %v185_v6, %v29_v7  ;;  %v62_v18 = vmul.f32 %v188_v12, %v56_v8 }
  0x8d   :  { %v41_v16 = vadd.f32 %v186_v10, %v35_v9 }
  0x8f   :  { %v45_v13 = vpop.permute.xlu0 %44  ;;  %v67_v15 = vpop.permute.xlu1 %66 }
  0x90   :  { %v51_v17 = vmul.f32 %v187_v11, %v45_v13  ;;  %v73_v20 = vmul.f32 %v189_v14, %v67_v15 }
  0x92   :  { %v52_v19 = vadd.f32 %v51_v17, %v41_v16 }
  0x94   :  { %v63_v21 = vadd.f32 %v62_v18, %v52_v19 }
  0x96   :  { %v272_v22 = vadd.f32 %v73_v20, %v63_v21 }
  0x98   :  { %v78_v23 = vand.u32 2139095040, %v272_v22  ;;  %v75_v27 = vand.u32 2147483647, %v272_v22  ;;  %vm77_vm7 = vcmp.lt.s32.totalorder %v272_v22, 0  ;;  %vm167_vm12 = vweird.f32 %v272_v22 }
  0x9a   :  { %v79_v24 = vshrl.u32 %v78_v23, 23  ;;  %v82_v30 = vand.u32 8388607, %v75_v27  ;;  %vm76_vm8 = vcmp.le.f32.partialorder %v75_v27, 0.7853982 }
  0x9c   :  { %v190_v25 = vadd.s32 4294967169, %v79_v24  ;;  %v83_v49 = vor.u32 8388608, %v82_v30 }
  0x9e   :  { %v85_v26 = vadd.s32 1, %v190_v25  ;;  %v123_v63 = vshll.u32 %v83_v49, 8 }
  0xa0   :  { %vm86_vm0 = vcmp.gt.s32.totalorder %v85_v26, 0 }
  0xa1   :  { %v87_v28 = vsel %vm86_vm0, %v85_v26, 0 }
  0xa2   :  { %v89_v29 = vand.u32 31, %v87_v28  ;;  %v88_v32 = vshrl.u32 %v87_v28, 5 }
  0xa4   :  { %v90_v31 = vsub.s32 32, %v89_v29  ;;  %v92_v34 = vshll.u32 %v245_v33, %v89_v29  ;;  %v95_v36 = vshll.u32 %v246_v35, %v89_v29  ;;  %v98_v40 = vshll.u32 %v247_v38, %v89_v29 }
  0xa5   :  { %v101_v43 = vshll.u32 %v248_v41, %v89_v29  ;;  %v104_v46 = vshll.u32 %v249_v44, %v89_v29  ;;  %vm107_vm1 = vcmp.lt.s32.totalorder %v88_v32, 1  ;;  %vm110_vm2 = vcmp.lt.s32.totalorder %v88_v32, 4 }
  0xa6   :  { %v93_v37 = vshrl.u32 %v246_v35, %v90_v31  ;;  %v96_v39 = vshrl.u32 %v247_v38, %v90_v31  ;;  %v99_v42 = vshrl.u32 %v248_v41, %v90_v31  ;;  %v102_v45 = vshrl.u32 %v249_v44, %v90_v31 }
  0xa7   :  { %v105_v48 = vshrl.u32 %v250_v47, %v90_v31  ;;  %v91_v58 = vshrl.u32 %v245_v33, %v90_v31  ;;  %vm109_vm3 = vcmp.lt.s32.totalorder %v88_v32, 3  ;;  %vm108_vm4 = vcmp.lt.s32.totalorder %v88_v32, 2 }
  0xa8   :  { %v94_v50 = vor.u32 %v93_v37, %v92_v34  ;;  %v97_v51 = vor.u32 %v96_v39, %v95_v36  ;;  %v100_v52 = vor.u32 %v99_v42, %v98_v40  ;;  %v103_v53 = vor.u32 %v102_v45, %v101_v43 }
  0xa9   :  { %v106_v54 = vor.u32 %v105_v48, %v104_v46 }
  0xaa   :  { %v112_v55 = vsel %vm110_vm2, %v100_v52, 2102212464  ;;  %v115_v56 = vsel %vm107_vm1, %v94_v50, %v97_v51  ;;  %v119_v57 = vsel %vm107_vm1, %v97_v51, %v100_v52  ;;  %v116_v59 = vsel %vm110_vm2, %v103_v53, 920167782 }
  0xab   :  { %v120_v60 = vsel %vm110_vm2, %v106_v54, 1326507024  ;;  %v117_v61 = vsel %vm109_vm3, %v100_v52, %v116_v59  ;;  %v111_v0 = vsel %vm107_vm1, %v91_v58, %v94_v50  ;;  %v113_v1 = vsel %vm109_vm3, %v97_v51, %v112_v55 }
  0xac   :  { %v121_v62 = vsel %vm109_vm3, %v103_v53, %v120_v60  ;;  %v118_v2 = vsel %vm108_vm4, %v115_v56, %v117_v61  ;;  %v114_v8 = vsel %vm108_vm4, %v111_v0, %v113_v1 }
  0xad   :  { %v122_v3 = vsel %vm108_vm4, %v119_v57, %v121_v62  ;;  %v281_v6 = vmul.u32.u64.low %v123_v63, %v118_v2  ;;  %v282_v7 = vmul.u32.u64.high %v123_v63, %v118_v2, %v281_v6  ;;  %v130_v10 = vmul.u32 %v123_v63, %v114_v8 }
  0xae   :  { %v278_v4 = vmul.u32.u64.low %v123_v63, %v122_v3  ;;  %v279_v5 = vmul.u32.u64.high %v123_v63, %v122_v3, %v278_v4 }
  0xaf   :  { %v133_v9 = vadd.s32 1, %v282_v7 }
  0xb0   :  { %vm132_vm5 = vc.u32 %v279_v5, %v281_v6  ;;  %v131_v23 = vadd.s32 %v281_v6, %v279_v5 }
  0xb1   :  { %v134_v11 = vsel %vm132_vm5, %v133_v9, %v282_v7 }
  0xb2   :  { %v135_v12 = vadd.s32 %v134_v11, %v130_v10 }
  0xb4   :  { %v136_v13 = vadd.s32 536870912, %v135_v12 }
  0xb6   :  { %v137_v14 = vshrl.u32 %v136_v13, 30 }
  0xb8   :  { %v138_v15 = vshll.u32 %v137_v14, 30  ;;  %v161_v37 = vsub.s32 4, %v137_v14 }
  0xba   :  { %v139_v16 = vsub.s32 %v135_v12, %v138_v15  ;;  %v162_v40 = vsel %vm77_vm7, %v161_v37, %v137_v14 }
  0xbb   :  { %v164_v41 = vsel %vm76_vm8, 0, %v162_v40 }
  0xbc   :  { %v141_v17 = vsub.s32 0, %v139_v16  ;;  %v168_v42 = vadd.s32 3, %v164_v41 }
  0xbe   :  { %v191_v18 = vmin.u32 %v141_v17, %v139_v16  ;;  %v169_v43 = vand.u32 3, %v168_v42 }
  0xc0   :  { %v143_v19 = vclz %v191_v18  ;;  %vm174_vm9 = vcmp.eq.s32.totalorder %v169_v43, 2  ;;  %vm171_vm10 = vcmp.eq.s32.totalorder %v169_v43, 0  ;;  %vm170_vm11 = vcmp.lt.s32.totalorder %v169_v43, 2 }
  0xc2   :  { %v192_v20 = vadd.s32 4294967294, %v143_v19 }
  0xc4   :  { %vm193_vm6 = vcmp.lt.s32.totalorder %v192_v20, 0 }
  0xc5   :  { %v146_v21 = vsel %vm193_vm6, 0, %v192_v20 }
  0xc6   :  { %v147_v24 = vsub.s32 32, %v146_v21  ;;  %v151_v25 = vsub.s32 4294967266, %v146_v21  ;;  %v148_v26 = vshll.u32 %v139_v16, %v146_v21 }
  0xc8   :  { %v149_v28 = vshrl.u32 %v131_v23, %v147_v24  ;;  %v152_v29 = vadd.s32 127, %v151_v25 }
  0xca   :  { %v150_v30 = vor.u32 %v149_v28, %v148_v26  ;;  %v153_v31 = vshll.u32 %v152_v29, 23 }
  0xcc   :  { %v154_v32 = vor.u32 4788187, %v153_v31  ;;  %v157_v34 = vcvt.s32.f32 %v150_v30 }
  0xce   :  { %v155_v33 = vand.u32 2147483647, %v154_v32 }
  0xd0   :  { %v158_v35 = vmul.f32 %v157_v34, %v155_v33 }
  0xd2   :  { %v159_v36 = vxor.u32 2147483648, %v158_v35 }
  0xd4   :  { %v160_v38 = vsel %vm77_vm7, %v159_v36, %v158_v35 }
  0xd5   :  { %v163_v39 = vsel %vm76_vm8, %v272_v22, %v160_v38 }
  0xd6   :  { %214 = vcosq.f32 %v163_v39 }
  0xd7   :  { %216 = vsinq.f32 %v163_v39 }
  0xe3   :  { %v215_v44 = vpop.eup %214 }
  0xe4   :  { %v217_v45 = vpop.eup %216  ;;  %v175_v46 = vxor.u32 2147483648, %v215_v44 }
  0xe5   :  { %v172_v47 = vxor.u32 2147483648, %v217_v45 }
  0xe6   :  { %v176_v48 = vsel %vm174_vm9, %v175_v46, %v217_v45 }
  0xe7   :  { %v173_v49 = vsel %vm171_vm10, %v215_v44, %v172_v47 }
  0xe8   :  { %v177_v27 = vsel %vm170_vm11, %v173_v49, %v176_v48 }
  0xe9   :  { %v178_v50 = vsel %vm167_vm12, nan, %v177_v27 }
  0xea   :  { %179 = vst [vmem:[%s298_s2] sm:$0x3] %v178_v50 }
  0xeb   :  { %184 = vsyncpa [#allocation3], 1 }

</bundles_post_ra>
